<compile_context>
chip_gen: v7x
topology: tpu7x:2x2x1
jax: 0.10.0
libtpu: 0.0.40
codegen_flags: <defaults>
</compile_context>

<pallas_src>
import jax
import jax.numpy as jnp
from jax.experimental import pallas as pl
from jax.experimental.pallas import tpu as pltpu


def _round_up(x, m):
    return ((x + m - 1) // m) * m


def mlp_policy_kernel(s_ref, w1_ref, b1_ref, w2_ref, b2_ref, wc_ref, bc_ref,
                      v_ref, x_ref):
    # fc1 + ReLU:  (TB, obs) @ (obs, H) + (1, H)   -- weights already (in, out)
    h1 = jnp.dot(s_ref[...], w1_ref[...], preferred_element_type=jnp.float32)
    h1 = jnp.maximum(h1 + b1_ref[...], 0.0)

    # fc2 + ReLU:  (TB, H) @ (H, H) + (1, H)
    h2 = jnp.dot(h1.astype(w2_ref.dtype), w2_ref[...],
                 preferred_element_type=jnp.float32)
    h2 = jnp.maximum(h2 + b2_ref[...], 0.0)

    # critic head on the VPU/XLU: broadcast-mul + lane reduction + SMEM scalar
    # bias (avoids a 1-output-column MXU pass and a lane-sparse matmul).
    v = jnp.sum(h2 * wc_ref[...], axis=-1, keepdims=True) + bc_ref[0]

    x_ref[...] = h2.astype(x_ref.dtype)
    v_ref[...] = v.astype(v_ref.dtype)


def mlp_policy_forward(s, params, *, tile_b=512, use_bf16=False):
    """Returns (value, hidden_x) matching MLPPolicy.forward.

    params = (w1, b1, w2, b2, wc, bc) with:
      w1: (obs, H), b1: (1, H), w2: (H, H), b2: (1, H),
      wc: (1, H) row vector, bc: (1,) scalar.
    """
    w1, b1, w2, b2, wc, bc = params
    B, obs = s.shape
    H = w1.shape[1]

    compute_dtype = jnp.bfloat16 if use_bf16 else jnp.float32
    s_c = s.astype(compute_dtype)
    w1_c = w1.astype(compute_dtype)
    w2_c = w2.astype(compute_dtype)

    # Batch tile: multiple of 8 (f32 sublane). Pad batch up to a tile multiple;
    # padded rows are sliced off at the end.
    tb = min(tile_b, _round_up(max(B, 1), 8))
    b_pad = _round_up(B, tb)
    if b_pad != B:
        s_c = jnp.pad(s_c, ((0, b_pad - B), (0, 0)))

    grid = (b_pad // tb,)

    out_shapes = (
        jax.ShapeDtypeStruct((b_pad, 1), jnp.float32),   # v
        jax.ShapeDtypeStruct((b_pad, H), jnp.float32),   # x
    )

    in_specs = [
        pl.BlockSpec((tb, obs), lambda i: (i, 0)),           # s  (streamed)
        pl.BlockSpec((obs, H), lambda i: (0, 0)),            # w1 (resident)
        pl.BlockSpec((1, H), lambda i: (0, 0)),              # b1 (resident)
        pl.BlockSpec((H, H), lambda i: (0, 0)),              # w2 (resident)
        pl.BlockSpec((1, H), lambda i: (0, 0)),              # b2 (resident)
        pl.BlockSpec((1, H), lambda i: (0, 0)),              # wc row (resident)
        pl.BlockSpec(memory_space=pltpu.MemorySpace.SMEM),   # bc scalar
    ]
    out_specs = (
        pl.BlockSpec((tb, 1), lambda i: (i, 0)),             # v
        pl.BlockSpec((tb, H), lambda i: (i, 0)),             # x
    )

    v, x = pl.pallas_call(
        mlp_policy_kernel,
        out_shape=out_shapes,
        grid=grid,
        in_specs=in_specs,
        out_specs=out_specs,
        compiler_params=pltpu.CompilerParams(
            dimension_semantics=("parallel",)),  # shard batch tiles across TCs (v7x)
    )(s_c, w1_c, b1, w2_c, b2, wc, bc)

    return v[:B], x[:B]


def init_params(key, obs_space, hidden=32):
    """Deterministic synthetic parameters, stored MXU-friendly:
    weights as (in, out), critic weight as a (1, hidden) row, critic bias (1,)."""
    ks = jax.random.split(key, 6)

    def lin(kw, kb, in_f, out_f):
        bound = 1.0 / jnp.sqrt(jnp.float32(in_f))   # torch default init bounds
        w = jax.random.uniform(kw, (in_f, out_f), jnp.float32, -bound, bound)
        b = jax.random.uniform(kb, (1, out_f), jnp.float32, -bound, bound)
        return w, b

    w1, b1 = lin(ks[0], ks[1], obs_space, hidden)
    w2, b2 = lin(ks[2], ks[3], hidden, hidden)
    wc_t, bc2 = lin(ks[4], ks[5], hidden, 1)
    wc = wc_t.T                 # (1, hidden) row vector for the VPU critic head
    bc = bc2.reshape((1,))      # scalar bias -> SMEM
    return (w1, b1, w2, b2, wc, bc)


if __name__ == "__main__":
    key = jax.random.PRNGKey(0)
    k_in, k_params = jax.random.split(key)

    obs_space = 4      # CartPole observation dim
    hidden = 32
    batch = 6          # exercises the pad-to-8 / slice-back path

    s = jax.random.normal(k_in, (batch, obs_space), jnp.float32)
    params = init_params(k_params, obs_space, hidden)
    w1, b1, w2, b2, wc, bc = params

    # ---------- f32 path ----------
    v, x = mlp_policy_forward(s, params, use_bf16=False)
    v, x = jax.block_until_ready(v), jax.block_until_ready(x)

    h1 = jnp.maximum(s @ w1 + b1, 0.0)
    h2 = jnp.maximum(h1 @ w2 + b2, 0.0)
    v_ref = jnp.sum(h2 * wc, axis=-1, keepdims=True) + bc[0]

    assert v.shape == (batch, 1) and x.shape == (batch, hidden)
    assert jnp.allclose(v, v_ref, atol=1e-5), "f32 value mismatch"
    assert jnp.allclose(x, h2, atol=1e-5), "f32 hidden mismatch"

    # ---------- bf16-matmul / f32-accumulate path (v6e/v7x) ----------
    v_bf, x_bf = mlp_policy_forward(s, params, use_bf16=True)
    v_bf, x_bf = jax.block_until_ready(v_bf), jax.block_until_ready(x_bf)

    sb = s.astype(jnp.bfloat16)
    w1b = w1.astype(jnp.bfloat16)
    w2b = w2.astype(jnp.bfloat16)
    h1b = jnp.maximum(
        jnp.dot(sb, w1b, preferred_element_type=jnp.float32) + b1, 0.0)
    h2b = jnp.maximum(
        jnp.dot(h1b.astype(jnp.bfloat16), w2b,
                preferred_element_type=jnp.float32) + b2, 0.0)
    vb_ref = jnp.sum(h2b * wc, axis=-1, keepdims=True) + bc[0]

    assert jnp.allclose(v_bf, vb_ref, atol=2e-2, rtol=2e-2), "bf16 value mismatch"
    assert jnp.allclose(x_bf, h2b, atol=2e-2, rtol=2e-2), "bf16 hidden mismatch"

    print("KERNEL_OK")
</pallas_src>

<mosaic_0001>
module attributes {stable_mosaic.version = 11 : i64} {
  func.func @mlp_policy_kernel(%arg0: i32, %arg1: memref<8x4xf32, #tpu.memory_space<vmem>>, %arg2: memref<4x32xf32, #tpu.memory_space<vmem>>, %arg3: memref<1x32xf32, #tpu.memory_space<vmem>>, %arg4: memref<32x32xf32, #tpu.memory_space<vmem>>, %arg5: memref<1x32xf32, #tpu.memory_space<vmem>>, %arg6: memref<1x32xf32, #tpu.memory_space<vmem>>, %arg7: memref<1xf32, #tpu.memory_space<smem>>, %arg8: memref<8x1xf32, #tpu.memory_space<vmem>>, %arg9: memref<8x32xf32, #tpu.memory_space<vmem>>) attributes {dimension_semantics = [#tpu.dimension_semantics<parallel>], iteration_bounds = array<i64: 1>, scalar_prefetch = 0 : i64, scratch_operands = 0 : i64, tpu.core_type = #tpu.core_type<tc>, window_params = [{transform_indices = @transform_0, window_bounds = array<i64: 8, 4>}, {pipeline_mode = #tpu.pipeline_mode<synchronous>, transform_indices = @transform_1, window_bounds = array<i64: 4, 32>}, {pipeline_mode = #tpu.pipeline_mode<synchronous>, transform_indices = @transform_2, window_bounds = array<i64: 1, 32>}, {pipeline_mode = #tpu.pipeline_mode<synchronous>, transform_indices = @transform_3, window_bounds = array<i64: 32, 32>}, {pipeline_mode = #tpu.pipeline_mode<synchronous>, transform_indices = @transform_4, window_bounds = array<i64: 1, 32>}, {pipeline_mode = #tpu.pipeline_mode<synchronous>, transform_indices = @transform_5, window_bounds = array<i64: 1, 32>}, {transform_indices = @transform_6, window_bounds = array<i64: 1>}, {transform_indices = @transform_7, window_bounds = array<i64: 8, 1>}, {transform_indices = @transform_8, window_bounds = array<i64: 8, 32>}]} {
    %c0 = arith.constant 0 : index
    %c0_0 = arith.constant 0 : index
    %0 = vector.load %arg1[%c0, %c0_0] : memref<8x4xf32, #tpu.memory_space<vmem>>, vector<8x4xf32>
    %c0_1 = arith.constant 0 : index
    %c0_2 = arith.constant 0 : index
    %1 = vector.load %arg2[%c0_1, %c0_2] : memref<4x32xf32, #tpu.memory_space<vmem>>, vector<4x32xf32>
    %cst = arith.constant dense<0.000000e+00> : vector<8x32xf32>
    %2 = tpu.matmul %0, %1, %cst {dimension_numbers = #tpu.dot_dimension_numbers<[1], [0], [0], [1], [0, 0, 1, 1], [], []>} : vector<8x4xf32>, vector<4x32xf32>, vector<8x32xf32> -> vector<8x32xf32>
    %c0_3 = arith.constant 0 : index
    %c0_4 = arith.constant 0 : index
    %3 = vector.load %arg3[%c0_3, %c0_4] : memref<1x32xf32, #tpu.memory_space<vmem>>, vector<1x32xf32>
    %4 = vector.broadcast %3 : vector<1x32xf32> to vector<8x32xf32>
    %5 = arith.addf %2, %4 : vector<8x32xf32>
    %cst_5 = arith.constant 0.000000e+00 : f32
    %6 = vector.broadcast %cst_5 : f32 to vector<8x32xf32>
    %7 = arith.maximumf %5, %6 : vector<8x32xf32>
    %c0_6 = arith.constant 0 : index
    %c0_7 = arith.constant 0 : index
    %8 = vector.load %arg4[%c0_6, %c0_7] : memref<32x32xf32, #tpu.memory_space<vmem>>, vector<32x32xf32>
    %cst_8 = arith.constant dense<0.000000e+00> : vector<8x32xf32>
    %9 = tpu.matmul %7, %8, %cst_8 {dimension_numbers = #tpu.dot_dimension_numbers<[1], [0], [0], [1], [0, 0, 1, 1], [], []>} : vector<8x32xf32>, vector<32x32xf32>, vector<8x32xf32> -> vector<8x32xf32>
    %c0_9 = arith.constant 0 : index
    %c0_10 = arith.constant 0 : index
    %10 = vector.load %arg5[%c0_9, %c0_10] : memref<1x32xf32, #tpu.memory_space<vmem>>, vector<1x32xf32>
    %11 = vector.broadcast %10 : vector<1x32xf32> to vector<8x32xf32>
    %12 = arith.addf %9, %11 : vector<8x32xf32>
    %cst_11 = arith.constant 0.000000e+00 : f32
    %13 = vector.broadcast %cst_11 : f32 to vector<8x32xf32>
    %14 = arith.maximumf %12, %13 : vector<8x32xf32>
    %c0_12 = arith.constant 0 : index
    %c0_13 = arith.constant 0 : index
    %15 = vector.load %arg6[%c0_12, %c0_13] : memref<1x32xf32, #tpu.memory_space<vmem>>, vector<1x32xf32>
    %16 = vector.broadcast %15 : vector<1x32xf32> to vector<8x32xf32>
    %17 = arith.mulf %14, %16 : vector<8x32xf32>
    %cst_14 = arith.constant dense<0.000000e+00> : vector<8xf32>
    %18 = vector.multi_reduction <add>, %17, %cst_14 [1] : vector<8x32xf32> to vector<8xf32>
    %19 = vector.shape_cast %18 : vector<8xf32> to vector<8x1xf32>
    %c0_15 = arith.constant 0 : index
    %20 = memref.load %arg7[%c0_15] : memref<1xf32, #tpu.memory_space<smem>>
    %21 = vector.broadcast %20 : f32 to vector<8x1xf32>
    %22 = arith.addf %19, %21 : vector<8x1xf32>
    %c0_16 = arith.constant 0 : index
    %c0_17 = arith.constant 0 : index
    %23 = vector.load %arg9[%c0_16, %c0_17] : memref<8x32xf32, #tpu.memory_space<vmem>>, vector<8x32xf32>
    tpu.vector_store %arg9[%c0_16, %c0_17], %14 {strides = array<i32>} : memref<8x32xf32, #tpu.memory_space<vmem>>, vector<8x32xf32>,
    %c0_18 = arith.constant 0 : index
    %c0_19 = arith.constant 0 : index
    %24 = vector.load %arg8[%c0_18, %c0_19] : memref<8x1xf32, #tpu.memory_space<vmem>>, vector<8x1xf32>
    tpu.vector_store %arg8[%c0_18, %c0_19], %22 {strides = array<i32>} : memref<8x1xf32, #tpu.memory_space<vmem>>, vector<8x1xf32>,
    return
  }
  func.func @transform_0(%arg0: i32) -> (i32, i32) {
    %c0_i32 = arith.constant 0 : i32
    %c0_i32_0 = arith.constant 0 : i32
    return %arg0, %c0_i32 : i32, i32
  }
  func.func @transform_1(%arg0: i32) -> (i32, i32) {
    %c0_i32 = arith.constant 0 : i32
    %c0_i32_0 = arith.constant 0 : i32
    %c0_i32_1 = arith.constant 0 : i32
    return %c0_i32, %c0_i32_0 : i32, i32
  }
  func.func @transform_2(%arg0: i32) -> (i32, i32) {
    %c0_i32 = arith.constant 0 : i32
    %c0_i32_0 = arith.constant 0 : i32
    %c0_i32_1 = arith.constant 0 : i32
    return %c0_i32, %c0_i32_0 : i32, i32
  }
  func.func @transform_3(%arg0: i32) -> (i32, i32) {
    %c0_i32 = arith.constant 0 : i32
    %c0_i32_0 = arith.constant 0 : i32
    %c0_i32_1 = arith.constant 0 : i32
    return %c0_i32, %c0_i32_0 : i32, i32
  }
  func.func @transform_4(%arg0: i32) -> (i32, i32) {
    %c0_i32 = arith.constant 0 : i32
    %c0_i32_0 = arith.constant 0 : i32
    %c0_i32_1 = arith.constant 0 : i32
    return %c0_i32, %c0_i32_0 : i32, i32
  }
  func.func @transform_5(%arg0: i32) -> (i32, i32) {
    %c0_i32 = arith.constant 0 : i32
    %c0_i32_0 = arith.constant 0 : i32
    %c0_i32_1 = arith.constant 0 : i32
    return %c0_i32, %c0_i32_0 : i32, i32
  }
  func.func @transform_6(%arg0: i32) -> i32 {
    %c0_i32 = arith.constant 0 : i32
    %c0_i32_0 = arith.constant 0 : i32
    return %c0_i32 : i32
  }
  func.func @transform_7(%arg0: i32) -> (i32, i32) {
    %c0_i32 = arith.constant 0 : i32
    %c0_i32_0 = arith.constant 0 : i32
    return %arg0, %c0_i32 : i32, i32
  }
  func.func @transform_8(%arg0: i32) -> (i32, i32) {
    %c0_i32 = arith.constant 0 : i32
    %c0_i32_0 = arith.constant 0 : i32
    return %arg0, %c0_i32 : i32, i32
  }
}

</mosaic_0001>

<bundles_post_ra>
// kernel: tpu_custom_call.1
= control target key start
LH: loop header
LB: loop body
LE: loop exit
PB: predicated region body
PF: predicated region fallthrough
CT: control target
= control target key end

     0   :  { %15 = vsyncpa [#allocation4], 0  ;;  %s441_s0 = inlined_call_operand.vmem [shape: f32[8,4], index: 0, kind: input, shape index: {}]   ;;  %s442_s1 = inlined_call_operand.vmem [shape: f32[4,32], index: 1, kind: input, shape index: {}]   ;;  %s443_s2 = inlined_call_operand.vmem [shape: f32[1,32], index: 2, kind: input, shape index: {}]   ;;  %s444_s3 = inlined_call_operand.hbm [shape: f32[32,32], index: 3, kind: input, shape index: {}]   ;;  %s445_s4 = inlined_call_operand.vmem [shape: f32[1,32], index: 4, kind: input, shape index: {}]   ;;  %s446_s5 = inlined_call_operand.vmem [shape: f32[1,32], index: 5, kind: input, shape index: {}]   ;;  %s447_s6 = inlined_call_operand.<no memory space> [shape: f32[1], index: 6, kind: input, shape index: {}]   ;;  %s448_s7 = inlined_call_operand.vmem [shape: f32[8,1], index: 7, kind: output, shape index: {0}]   ;;  %s449_s8 = inlined_call_operand.hbm [shape: f32[8,32], index: 8, kind: output, shape index: {1}]  }
   0x1   :  { %16 = vsyncpa [#allocation5], 0  ;;  %s344_s27 = smov [#allocation3]   ;;  %s296_s9 = scalar_lea.hbm %s444_s3, 512 }
   0x2   :  { %s28_s28 = sshll.u32 %s344_s27, 4  ;;  %p297_p0 = scmp.ne.s32.totalorder %s444_s3, %s296_s9  ;;  %s29_s28 = int_to_ptr.vmem [resolvable:$true] %s28_s28 }
   0x3   :  { %p300_p1 = scmp.lt.u32.totalorder %s296_s9, %s444_s3 }
   0x5   :  { %p302_p2 = pnand %p300_p1, %p297_p0 }
   0x7   :  { %305 = shalt.err (!%p302_p2)
}
   0x8   :  { %s306_s14 = scalar_lea.vmem %s29_s28, 512  ;;  %p311_p4 = scmp.lt.s32.totalorder %s29_s28, %s29_s28 }
   0x9   :  { %p307_p3 = scmp.ne.s32.totalorder %s29_s28, %s306_s14  ;;  %p312_p5 = scmp.lt.s32.totalorder %s306_s14, %s306_s14 }
   0xb   :  { %p313_p6 = por %p312_p5, %p311_p4 }
   0xd   :  { %p314_p7 = pnand %p313_p6, %p307_p3 }
   0xf   :  { %317 = shalt.err (!%p314_p7)
}
  0x10   :  { %s345_s15 = smov 128   ;;  %s346_s16 = smov 8  }
  0x11   :  { %34 = dma.hbm_to_vmem [thread:$0]  %s444_s3, 512, %s29_s28, [#allocation4], %s345_s15, %s345_s15, %s346_s16  }
  0x12   :  { %340 = dma.done.wait [#allocation4], 512  }
  0x13   :  { %341 = vsyncadd [#allocation4], 4294966784  ;;  %v347_v0 = vmov 0.0   ;;  %vm348_vm0 = vmmov 0   ;;  %v349_v1 = vmov 0.0|0.0   ;;  %vm57_vm1 = vcmask 1043456  }
  0x14   :  { %267 = vmatprep.subr.mxu0 %v347_v0  ;;  %269 = vmatprep.mubr.msk.f32.mxu0 %vm348_vm0, %v347_v0  ;;  %vm53_vm2 = vcmask 31744   ;;  %v45_v2 = vld [vmem:[%s442_s1] sm:$0xf]  ;;  %v133_v5 = vld [vmem:[#allocation3 + $0x8] sm:$0xff]  ;;  %v134_v7 = vld [vmem:[#allocation3 + $0x10] sm:$0xff]  ;;  %vm143_vm3 = vcmask 261120  }
  0x15   :  { %283 = vmatprep.subr.bf16.mxu1 %v349_v1  ;;  %280 = vmatprep.mubr.msk.f32.mxu1 %vm348_vm0, %v347_v0  ;;  %v44_v3 = vld [vmem:[%s441_s0] sm:$0xff]  ;;  %v135_v8 = vld [vmem:[#allocation3 + $0x18] sm:$0xff] }
  0x16   :  { %v132_v4 = vld [vmem:[#allocation3] sm:$0xff]  ;;  %268 = vmatpush3.msk.msra.mxu0 %vm57_vm1, %v45_v2  ;;  %v287_v9 = vpack.c.bf16 %v135_v8, %v134_v7 }
  0x17   :  { %270 = vmatmul.mubr.msk.f32.vlgmr.msra.gmra.mrb[0].mxu0 %vm53_vm2, %v44_v3  ;;  %v284_v6 = vpack.c.bf16 %v133_v5, %v132_v4  ;;  %v254_v10 = vld [vmem:[%s443_s2] ss:$0 sm:$0xff]  ;;  %s350_s2 = smov [#allocation6]  }
  0x18   :  { %v257_v15 = vld [vmem:[%s445_s4] ss:$0 sm:$0xff]  ;;  %s243_s26 = sshll.u32 %s350_s2, 4  ;;  %s244_s26 = int_to_ptr.vmem [resolvable:$true] %s243_s26 }
  0x19   :  { %285 = vmatpush3.bf16.msra.mxu1 %v284_v6  ;;  %v259_v19 = vld [vmem:[%s446_s5] ss:$0 sm:$0xff]  ;;  %s318_s27 = scalar_lea.vmem %s244_s26, 128  ;;  %p323_p9 = scmp.lt.s32.totalorder %s244_s26, %s244_s26 }
  0x1a   :  { %286 = vmatprep.subr.bf16.mxu1 %v349_v1  ;;  %p319_p8 = scmp.ne.s32.totalorder %s244_s26, %s318_s27  ;;  %p324_p10 = scmp.lt.s32.totalorder %s318_s27, %s318_s27 }
  0x1c   :  { %p325_p11 = por %p324_p10, %p323_p9 }
  0x1d   :  { %288 = vmatpush3.bf16.msra.mxu1 %v287_v9 }
  0x1e   :  { %p326_p12 = pnand %p325_p11, %p319_p8 }
  0xea   :  { %v127_v11 = vpop.f32.mrb[0].mxu0 }
  0xeb   :  { %v128_v12 = vadd.f32 %v254_v10, %v127_v11  ;;  %v271_v13 = vpop.f32.mrb[1].mxu0 }
  0xed   :  { %v131_v14 = vmax.f32 %v128_v12, 0.0 }
  0xef   :  { %281 = vmatmul.mubr.msk.f32.vlgmr.msra.gmra.mrb[0].mxu1 %vm143_vm3, %v131_v14 }
 0x1c2   :  { %v213_v16 = vpop.f32.mrb[0].mxu1 }
 0x1c3   :  { %v214_v17 = vadd.f32 %v257_v15, %v213_v16  ;;  %v282_v18 = vpop.f32.mrb[1].mxu1 }
 0x1c5   :  { %v217_v20 = vmax.f32 %v214_v17, 0.0 }
 0x1c7   :  { %232 = vst.msk [vmem:[#allocation6] sm:$0xff] %vm143_vm3, %v217_v20  ;;  %v225_v21 = vmul.f32 %v259_v19, %v217_v20 }
 0x1c9   :  { %v226_v22 = vsel %vm143_vm3, %v225_v21, 0.0 }
 0x1ca   :  { %227 = vadd.xlane.f32.xlu0 %v226_v22 }
 0x1cb   :  { %329 = shalt.err (!%p326_p12)
}
 0x1cc   :  { %s330_s29 = scalar_lea.hbm %s449_s8, 128 }
 0x1cd   :  { %p331_p13 = scmp.ne.s32.totalorder %s449_s8, %s330_s29  ;;  %p334_p0 = scmp.lt.u32.totalorder %s330_s29, %s449_s8 }
 0x1cf   :  { %p336_p1 = pnand %p334_p0, %p331_p13 }
 0x1d1   :  { %339 = shalt.err (!%p336_p1)
}
 0x1d2   :  { %246 = dma.vmem_to_hbm [thread:$0]  %s244_s26, 128, %s449_s8, [#allocation5]   ;;  %v230_v23 = vstv %s447_s6  ;;  %vm233_vm4 = vcmask 7168  }
 0x257   :  { %v228_v24 = vpop.xlane.xlu0 %227 }
 0x258   :  { %v231_v25 = vadd.f32 %v230_v23, %v228_v24 }
 0x25a   :  { %234 = vst.msk [vmem:[%s448_s7] sm:$0xff] %vm233_vm4, %v231_v25 }
 0x25b   :  { %342 = dma.done.wait [#allocation5], 128  }
 0x25c   :  { %343 = vsyncadd [#allocation5], 4294967168 }
 0x25d   :  { %252 = vsyncpa [#allocation4], 1 }
 0x25e   :  { %253 = vsyncpa [#allocation5], 1 }

</bundles_post_ra>
